<compile_context>
chip_gen: v5e
topology: v5e:2x2
jax: 0.10.0
libtpu: 0.0.40
codegen_flags: <defaults>
</compile_context>

<pallas_src>
import functools

import jax
import jax.numpy as jnp
from jax.experimental import pallas as pl
from jax.experimental.pallas import tpu as pltpu


def _round_up(x, m):
    return ((x + m - 1) // m) * m


def _tpu_generation():
    """Generation-aware VMEM budget / tile defaults (trace-time query)."""
    kind = ""
    try:
        kind = jax.devices()[0].device_kind.lower()
    except Exception:
        pass
    if "v7" in kind:      # 64 MiB VMEM per TC, 2 TCs/chip
        return dict(budget=52 << 20, limit=60 << 20, cores=2, tm=256, tf=512)
    if "v6" in kind:      # 128 MiB VMEM, 918 TF/s bf16
        return dict(budget=100 << 20, limit=110 << 20, cores=1, tm=768, tf=1024)
    if "v5" in kind:      # 128 MiB VMEM
        return dict(budget=100 << 20, limit=110 << 20, cores=1, tm=512, tf=1024)
    # unknown chip: conservative
    return dict(budget=48 << 20, limit=56 << 20, cores=1, tm=256, tf=512)


# ----------------------------------------------------------------------------
# Kernels
# ----------------------------------------------------------------------------
def _ffn_resident_kernel(x_ref, w1_ref, b1_ref, w2_ref, b2_ref, o_ref):
    # Full-width weights resident in VMEM; single pass over d_ffn.
    h = jnp.dot(x_ref[...], w1_ref[...], preferred_element_type=jnp.float32)
    h = jnp.maximum(h + b1_ref[...], 0.0)                      # bias + ReLU (f32)
    y = jnp.dot(h.astype(w2_ref.dtype), w2_ref[...],
                preferred_element_type=jnp.float32)
    o_ref[...] = (y + b2_ref[...]).astype(o_ref.dtype)


def _ffn_streamed_kernel(x_ref, w1_ref, b1_ref, w2_ref, b2_ref, o_ref, acc_ref):
    # d_ffn streamed in tf-wide slabs along grid axis 1 ("arbitrary").
    k = pl.program_id(1)

    @pl.when(k == 0)
    def _():
        # Fold b2 into the accumulator init (drops the epilogue add).
        acc_ref[...] = jnp.broadcast_to(b2_ref[...], acc_ref.shape)

    h = jnp.dot(x_ref[...], w1_ref[...], preferred_element_type=jnp.float32)
    h = jnp.maximum(h + b1_ref[...], 0.0)                      # bias + ReLU (f32)
    acc_ref[...] += jnp.dot(h.astype(w2_ref.dtype), w2_ref[...],
                            preferred_element_type=jnp.float32)

    @pl.when(k == pl.num_programs(1) - 1)
    def _():
        o_ref[...] = acc_ref[...].astype(o_ref.dtype)


# ----------------------------------------------------------------------------
# Wrapper
# ----------------------------------------------------------------------------
def _streamed_footprint(tm, tf, d_model, cbytes, out_bytes):
    return (2 * tm * d_model * cbytes            # x tile, double-buffered
            + 2 * tm * d_model * out_bytes       # out tile, double-buffered
            + 2 * d_model * tf * cbytes          # W1 slab, double-buffered
            + 2 * tf * d_model * cbytes          # W2 slab, double-buffered
            + 2 * (tf + d_model) * 4             # biases (f32)
            + tm * d_model * 4                   # f32 accumulator scratch
            + tm * tf * 4)                       # f32 h temporary


@functools.partial(jax.jit,
                   static_argnames=("tm", "tf", "resident", "compute_dtype"))
def feed_forward(x, w1_t, b1, w2_t, b2, *, tm=None, tf=None, resident=None,
                 compute_dtype=jnp.bfloat16):
    """out = relu(x @ w1_t + b1) @ w2_t + b2  (matmuls in `compute_dtype`).

    x    : (batch, seq, d_model)
    w1_t : (d_model, d_ffn)   (PyTorch linear1.weight transposed)
    b1   : (d_ffn,)
    w2_t : (d_ffn, d_model)   (PyTorch linear2.weight transposed)
    b2   : (d_model,)
    """
    batch, seq, d_model = x.shape
    d_ffn = w1_t.shape[1]
    M = batch * seq
    out_dtype = x.dtype

    cfg = _tpu_generation()
    cbytes = jnp.dtype(compute_dtype).itemsize
    out_bytes = jnp.dtype(out_dtype).itemsize

    # --- row tile ----------------------------------------------------------
    if tm is None:
        tm = cfg["tm"]
    tm = _round_up(max(8, min(tm, _round_up(M, 8))), 8)
    M_pad = _round_up(M, tm)
    # Megacore: keep the "parallel" row axis >= 2 tiles on multi-core chips.
    if cfg["cores"] > 1 and M_pad // tm == 1 and M >= 256:
        tm = _round_up((M + 1) // 2, 8)
        M_pad = _round_up(M, tm)

    # --- resident-vs-streamed decision --------------------------------------
    F_r = _round_up(d_ffn, 128)
    resident_fp = (2 * 2 * d_model * F_r * cbytes          # W1 + W2 (dbl-buffered)
                   + 2 * tm * d_model * (cbytes + out_bytes)
                   + tm * F_r * 4 + tm * d_model * 4
                   + 2 * (F_r + d_model) * 4)
    if resident is None:
        use_resident = (tf is None) and (resident_fp <= cfg["budget"])
    else:
        use_resident = bool(resident)

    # --- hidden tile (streamed path only) -----------------------------------
    if not use_resident:
        if tf is None:
            tf = cfg["tf"]
        tf = max(128, _round_up(min(tf, _round_up(d_ffn, 128)), 128))
        while _streamed_footprint(tm, tf, d_model, cbytes, out_bytes) > cfg["budget"]:
            if tf > 256:
                tf //= 2
            elif tm > 128:
                tm = max(128, _round_up(tm // 2, 8))
                M_pad = _round_up(M, tm)
            else:
                break
        F_pad = _round_up(d_ffn, tf)
    else:
        F_pad = F_r

    # --- pad & cast operands -------------------------------------------------
    x2d = x.reshape(M, d_model).astype(compute_dtype)
    if M_pad != M:
        x2d = jnp.pad(x2d, ((0, M_pad - M), (0, 0)))
    w1c = w1_t.astype(compute_dtype)
    w2c = w2_t.astype(compute_dtype)
    b1f = b1.astype(jnp.float32)
    b2f = b2.astype(jnp.float32)
    if F_pad != d_ffn:
        # zero-padded hidden units: relu(0 + 0) = 0 and zero W2 rows => no effect
        w1c = jnp.pad(w1c, ((0, 0), (0, F_pad - d_ffn)))
        b1f = jnp.pad(b1f, ((0, F_pad - d_ffn),))
        w2c = jnp.pad(w2c, ((0, F_pad - d_ffn), (0, 0)))
    b1_2d = b1f.reshape(1, F_pad)
    b2_2d = b2f.reshape(1, d_model)

    # --- cost hint (includes weight re-stream factor on the streamed path) --
    weight_reads = 1 if use_resident else (M_pad // tm)
    cost = pl.CostEstimate(
        flops=4 * M_pad * d_model * F_pad,
        transcendentals=0,
        bytes_accessed=(M_pad * d_model * cbytes
                        + M_pad * d_model * out_bytes
                        + weight_reads * 2 * d_model * F_pad * cbytes
                        + (F_pad + d_model) * 4),
    )
    vmem_limit = cfg["limit"]

    if use_resident:
        out2d = pl.pallas_call(
            _ffn_resident_kernel,
            out_shape=jax.ShapeDtypeStruct((M_pad, d_model), out_dtype),
            grid_spec=pltpu.PrefetchScalarGridSpec(
                num_scalar_prefetch=0,
                grid=(M_pad // tm,),
                in_specs=[
                    pl.BlockSpec((tm, d_model), lambda i: (i, 0)),   # x row tile
                    pl.BlockSpec((d_model, F_pad), lambda i: (0, 0)),  # W1 (resident)
                    pl.BlockSpec((1, F_pad), lambda i: (0, 0)),        # b1
                    pl.BlockSpec((F_pad, d_model), lambda i: (0, 0)),  # W2 (resident)
                    pl.BlockSpec((1, d_model), lambda i: (0, 0)),      # b2
                ],
                out_specs=pl.BlockSpec((tm, d_model), lambda i: (i, 0)),
            ),
            compiler_params=pltpu.CompilerParams(
                dimension_semantics=("parallel",),
                vmem_limit_bytes=vmem_limit),
            cost_estimate=cost,
        )(x2d, w1c, b1_2d, w2c, b2_2d)
    else:
        out2d = pl.pallas_call(
            _ffn_streamed_kernel,
            out_shape=jax.ShapeDtypeStruct((M_pad, d_model), out_dtype),
            grid_spec=pltpu.PrefetchScalarGridSpec(
                num_scalar_prefetch=0,
                grid=(M_pad // tm, F_pad // tf),
                in_specs=[
                    pl.BlockSpec((tm, d_model), lambda i, k: (i, 0)),   # x row tile
                    pl.BlockSpec((d_model, tf), lambda i, k: (0, k)),   # W1 slab
                    pl.BlockSpec((1, tf), lambda i, k: (0, k)),         # b1 slab
                    pl.BlockSpec((tf, d_model), lambda i, k: (k, 0)),   # W2 slab
                    pl.BlockSpec((1, d_model), lambda i, k: (0, 0)),    # b2
                ],
                out_specs=pl.BlockSpec((tm, d_model), lambda i, k: (i, 0)),
                scratch_shapes=[pltpu.VMEM((tm, d_model), jnp.float32)],
            ),
            compiler_params=pltpu.CompilerParams(
                dimension_semantics=("parallel", "arbitrary"),
                vmem_limit_bytes=vmem_limit),
            cost_estimate=cost,
        )(x2d, w1c, b1_2d, w2c, b2_2d)

    return out2d[:M].reshape(batch, seq, d_model)


# ----------------------------------------------------------------------------
# Reference / init helpers
# ----------------------------------------------------------------------------
def _reference(x, w1_t, b1, w2_t, b2, compute_dtype=jnp.bfloat16):
    """Same math, same bf16 casts, pure jnp (for tolerance-tight checks)."""
    xc = x.astype(compute_dtype)
    h = jnp.dot(xc, w1_t.astype(compute_dtype), preferred_element_type=jnp.float32)
    h = jnp.maximum(h + b1.astype(jnp.float32), 0.0)
    y = jnp.dot(h.astype(compute_dtype), w2_t.astype(compute_dtype),
                preferred_element_type=jnp.float32)
    return (y + b2.astype(jnp.float32)).astype(x.dtype)


def init_params(key, d_model, d_ffn, dtype=jnp.float32):
    """Deterministic init mimicking nn.Linear (uniform +/- 1/sqrt(fan_in))."""
    k1, k2, k3, k4 = jax.random.split(key, 4)
    bound1 = 1.0 / (d_model ** 0.5)
    bound2 = 1.0 / (d_ffn ** 0.5)
    # Stored already transposed to (in, out) for the kernel.
    w1_t = jax.random.uniform(k1, (d_model, d_ffn), dtype, -bound1, bound1)
    b1 = jax.random.uniform(k2, (d_ffn,), dtype, -bound1, bound1)
    w2_t = jax.random.uniform(k3, (d_ffn, d_model), dtype, -bound2, bound2)
    b2 = jax.random.uniform(k4, (d_model,), dtype, -bound2, bound2)
    return w1_t, b1, w2_t, b2


if __name__ == "__main__":
    # Small shapes matching the module spec (batch=2, seq=8, d_model=32, d_ffn=64).
    batch, seq, d_model, d_ffn = 2, 8, 32, 64

    key = jax.random.PRNGKey(0)
    kx, kp = jax.random.split(key)
    x = jax.random.normal(kx, (batch, seq, d_model), jnp.float32)
    w1_t, b1, w2_t, b2 = init_params(kp, d_model, d_ffn)

    out = jax.block_until_ready(feed_forward(x, w1_t, b1, w2_t, b2))
    assert out.shape == (batch, seq, d_model)
    # Tight check against a bf16-consistent reference ...
    ref = _reference(x, w1_t, b1, w2_t, b2)
    assert jnp.allclose(out, ref, atol=2e-2, rtol=2e-2)
    # ... and a looser check against full-f32 PyTorch semantics (bf16 matmuls).
    ref32 = jnp.maximum(x @ w1_t + b1, 0.0) @ w2_t + b2
    assert jnp.allclose(out, ref32, atol=5e-2, rtol=5e-2)

    # Exercise the streamed + padded path: M=150 rows (not a multiple of tm),
    # d_ffn=1024 tiled by tf=512 (2 reduction steps), lane-dense d_model=128.
    b2_, s2_, dm2, df2 = 3, 50, 128, 1024
    x2 = jax.random.normal(jax.random.PRNGKey(1), (b2_, s2_, dm2), jnp.float32)
    p2 = init_params(jax.random.PRNGKey(2), dm2, df2)
    out2 = jax.block_until_ready(
        feed_forward(x2, *p2, tm=64, tf=512, resident=False))
    ref2 = _reference(x2, *p2)
    assert out2.shape == (b2_, s2_, dm2)
    assert jnp.allclose(out2, ref2, atol=2e-2, rtol=2e-2)

    print("KERNEL_OK")
</pallas_src>

<mosaic_0001>
module attributes {stable_mosaic.version = 11 : i64} {
  func.func @_ffn_resident_kernel(%arg0: i32, %arg1: memref<16x32xbf16, #tpu.memory_space<vmem>>, %arg2: memref<32x128xbf16, #tpu.memory_space<vmem>>, %arg3: memref<1x128xf32, #tpu.memory_space<vmem>>, %arg4: memref<128x32xbf16, #tpu.memory_space<vmem>>, %arg5: memref<1x32xf32, #tpu.memory_space<vmem>>, %arg6: memref<16x32xf32, #tpu.memory_space<vmem>>) attributes {dimension_semantics = [#tpu.dimension_semantics<parallel>], iteration_bounds = array<i64: 1>, scalar_prefetch = 0 : i64, scratch_operands = 0 : i64, tpu.core_type = #tpu.core_type<tc>, window_params = [{transform_indices = @transform_0, window_bounds = array<i64: 16, 32>}, {pipeline_mode = #tpu.pipeline_mode<synchronous>, transform_indices = @transform_1, window_bounds = array<i64: 32, 128>}, {pipeline_mode = #tpu.pipeline_mode<synchronous>, transform_indices = @transform_2, window_bounds = array<i64: 1, 128>}, {pipeline_mode = #tpu.pipeline_mode<synchronous>, transform_indices = @transform_3, window_bounds = array<i64: 128, 32>}, {pipeline_mode = #tpu.pipeline_mode<synchronous>, transform_indices = @transform_4, window_bounds = array<i64: 1, 32>}, {transform_indices = @transform_5, window_bounds = array<i64: 16, 32>}]} {
    %c0 = arith.constant 0 : index
    %c0_0 = arith.constant 0 : index
    %0 = vector.load %arg1[%c0, %c0_0] : memref<16x32xbf16, #tpu.memory_space<vmem>>, vector<16x32xbf16>
    %c0_1 = arith.constant 0 : index
    %c0_2 = arith.constant 0 : index
    %1 = vector.load %arg2[%c0_1, %c0_2] : memref<32x128xbf16, #tpu.memory_space<vmem>>, vector<32x128xbf16>
    %cst = arith.constant dense<0.000000e+00> : vector<16x128xf32>
    %2 = tpu.matmul %0, %1, %cst {dimension_numbers = #tpu.dot_dimension_numbers<[1], [0], [0], [1], [0, 0, 1, 1], [], []>} : vector<16x32xbf16>, vector<32x128xbf16>, vector<16x128xf32> -> vector<16x128xf32>
    %c0_3 = arith.constant 0 : index
    %c0_4 = arith.constant 0 : index
    %3 = vector.load %arg3[%c0_3, %c0_4] : memref<1x128xf32, #tpu.memory_space<vmem>>, vector<1x128xf32>
    %4 = vector.broadcast %3 : vector<1x128xf32> to vector<16x128xf32>
    %5 = arith.addf %2, %4 : vector<16x128xf32>
    %cst_5 = arith.constant 0.000000e+00 : f32
    %6 = vector.broadcast %cst_5 : f32 to vector<16x128xf32>
    %7 = arith.maximumf %5, %6 : vector<16x128xf32>
    %8 = arith.truncf %7 : vector<16x128xf32> to vector<16x128xbf16>
    %c0_6 = arith.constant 0 : index
    %c0_7 = arith.constant 0 : index
    %9 = vector.load %arg4[%c0_6, %c0_7] : memref<128x32xbf16, #tpu.memory_space<vmem>>, vector<128x32xbf16>
    %cst_8 = arith.constant dense<0.000000e+00> : vector<16x32xf32>
    %10 = tpu.matmul %8, %9, %cst_8 {dimension_numbers = #tpu.dot_dimension_numbers<[1], [0], [0], [1], [0, 0, 1, 1], [], []>} : vector<16x128xbf16>, vector<128x32xbf16>, vector<16x32xf32> -> vector<16x32xf32>
    %c0_9 = arith.constant 0 : index
    %c0_10 = arith.constant 0 : index
    %11 = vector.load %arg5[%c0_9, %c0_10] : memref<1x32xf32, #tpu.memory_space<vmem>>, vector<1x32xf32>
    %12 = vector.broadcast %11 : vector<1x32xf32> to vector<16x32xf32>
    %13 = arith.addf %10, %12 : vector<16x32xf32>
    %c0_11 = arith.constant 0 : index
    %c0_12 = arith.constant 0 : index
    %14 = vector.load %arg6[%c0_11, %c0_12] : memref<16x32xf32, #tpu.memory_space<vmem>>, vector<16x32xf32>
    tpu.vector_store %arg6[%c0_11, %c0_12], %13 {strides = array<i32>} : memref<16x32xf32, #tpu.memory_space<vmem>>, vector<16x32xf32>,
    return
  }
  func.func @transform_0(%arg0: i32) -> (i32, i32) {
    %c0_i32 = arith.constant 0 : i32
    %c0_i32_0 = arith.constant 0 : i32
    return %arg0, %c0_i32 : i32, i32
  }
  func.func @transform_1(%arg0: i32) -> (i32, i32) {
    %c0_i32 = arith.constant 0 : i32
    %c0_i32_0 = arith.constant 0 : i32
    %c0_i32_1 = arith.constant 0 : i32
    return %c0_i32, %c0_i32_0 : i32, i32
  }
  func.func @transform_2(%arg0: i32) -> (i32, i32) {
    %c0_i32 = arith.constant 0 : i32
    %c0_i32_0 = arith.constant 0 : i32
    %c0_i32_1 = arith.constant 0 : i32
    return %c0_i32, %c0_i32_0 : i32, i32
  }
  func.func @transform_3(%arg0: i32) -> (i32, i32) {
    %c0_i32 = arith.constant 0 : i32
    %c0_i32_0 = arith.constant 0 : i32
    %c0_i32_1 = arith.constant 0 : i32
    return %c0_i32, %c0_i32_0 : i32, i32
  }
  func.func @transform_4(%arg0: i32) -> (i32, i32) {
    %c0_i32 = arith.constant 0 : i32
    %c0_i32_0 = arith.constant 0 : i32
    %c0_i32_1 = arith.constant 0 : i32
    return %c0_i32, %c0_i32_0 : i32, i32
  }
  func.func @transform_5(%arg0: i32) -> (i32, i32) {
    %c0_i32 = arith.constant 0 : i32
    %c0_i32_0 = arith.constant 0 : i32
    return %arg0, %c0_i32 : i32, i32
  }
}

</mosaic_0001>

<bundles_post_ra>
// kernel: feed_forward.1
= control target key start
LH: loop header
LB: loop body
LE: loop exit
PB: predicated region body
PF: predicated region fallthrough
CT: control target
= control target key end

     0   :  { %s337_s0 = inlined_call_operand.vmem [shape: bf16[16,32], index: 0, kind: input, shape index: {}]   ;;  %s338_s1 = inlined_call_operand.vmem [shape: bf16[32,128], index: 1, kind: input, shape index: {}]   ;;  %s339_s2 = inlined_call_operand.vmem [shape: f32[1,128], index: 2, kind: input, shape index: {}]   ;;  %s340_s3 = inlined_call_operand.vmem [shape: bf16[128,32], index: 3, kind: input, shape index: {}]   ;;  %s341_s4 = inlined_call_operand.vmem [shape: f32[1,32], index: 4, kind: input, shape index: {}]   ;;  %s342_s5 = inlined_call_operand.hbm [shape: f32[16,32], index: 5, kind: output, shape index: {}]  }
   0x1   :  { %v219_v0 = vld [vmem:[%s338_s1 + $0x8] sm:$0xff]  ;;  %v227_v1 = vld [vmem:[%s340_s3 + $0x38] sm:$0xff]  ;;  %v218_v2 = vld [vmem:[%s338_s1] sm:$0xff] }
   0x2   :  { %59 = vmatpush.bf16.msra.mxu0 %v219_v0  ;;  %138 = vmatpush.bf16.msra.mxu1 %v227_v1  ;;  %v226_v3 = vld [vmem:[%s340_s3 + $0x30] sm:$0xff] }
   0x3   :  { %10 = vsyncpa [#allocation3], 0  ;;  %v217_v4 = vld [vmem:[%s337_s0] sm:$0xff]  ;;  %vm49_vm0 = vcmask 261120   ;;  %v225_v5 = vld [vmem:[%s340_s3 + $0x28] sm:$0xff]  ;;  %s260_s20 = smov 128  }
   0x4   :  { %v224_v6 = vld [vmem:[%s340_s3 + $0x20] sm:$0xff]  ;;  %v223_v7 = vld [vmem:[%s340_s3 + $0x18] sm:$0xff]  ;;  %v222_v8 = vld [vmem:[%s340_s3 + $0x10] sm:$0xff]  ;;  %s261_s21 = smov 8  }
   0x5   :  { %v221_v9 = vld [vmem:[%s340_s3 + $0x8] sm:$0xff]  ;;  %v220_v10 = vld [vmem:[%s340_s3] sm:$0xff]  ;;  %s259_s3 = smov [#allocation2]  }
   0x6   :  { %60 = vmatpush.bf16.msra.mxu0 %v218_v2  ;;  %139 = vmatpush.bf16.msra.mxu1 %v226_v3  ;;  %v231_v12 = vld [vmem:[%s339_s2] ss:$0 sm:$0xff]  ;;  %s158_s17 = sshll.u32 %s259_s3, 4  ;;  %s160_s2 = sshll.u32 %s342_s5, 4  ;;  %s159_s17 = int_to_ptr.vmem [resolvable:$true] %s158_s17  ;;  %s161_s2 = int_to_ptr.hbm [resolvable:$true] %s160_s2 }
   0x7   :  { %v232_v19 = vld [vmem:[%s341_s4] ss:$0 sm:$0xff] }
   0x9   :  { %184 = vmatmul.msk.bf16.vlgmr.msra.gmra.mxu0 %vm49_vm0, %v217_v4 }
   0xa   :  { %140 = vmatpush.bf16.msra.mxu1 %v225_v5 }
   0xe   :  { %141 = vmatpush.bf16.msra.mxu1 %v224_v6 }
  0x12   :  { %142 = vmatpush.bf16.msra.mxu1 %v223_v7 }
  0x16   :  { %143 = vmatpush.bf16.msra.mxu1 %v222_v8 }
  0x1a   :  { %144 = vmatpush.bf16.msra.mxu1 %v221_v9 }
  0x1e   :  { %145 = vmatpush.bf16.msra.mxu1 %v220_v10 }
  0x86   :  { %v62_v11 = vpop.f32.mrf.mxu0 }
  0x87   :  { %v63_v13 = vadd.f32 %v231_v12, %v62_v11 }
  0x89   :  { %v67_v16 = vmax.f32 %v63_v13, 0.0 }
  0x8e   :  { %v64_v14 = vpop.f32.mrf.mxu0 }
  0x8f   :  { %v65_v15 = vadd.f32 %v231_v12, %v64_v14 }
  0x91   :  { %v68_v17 = vmax.f32 %v65_v15, 0.0 }
  0x93   :  { %v69_v18 = vpack.c.bf16 %v68_v17, %v67_v16 }
  0x95   :  { %146 = vmatmul.bf16.vlgmr.msra.gmra.mxu1 %v69_v18 }
 0x112   :  { %v147_v20 = vpop.f32.mrf.mxu1 }
 0x113   :  { %v148_v21 = vadd.f32 %v232_v19, %v147_v20 }
 0x115   :  { %152 = vst.msk [vmem:[#allocation2] sm:$0xff] %vm49_vm0, %v148_v21 }
 0x11a   :  { %v149_v22 = vpop.f32.mrf.mxu1 }
 0x11b   :  { %v150_v23 = vadd.f32 %v232_v19, %v149_v22 }
 0x11d   :  { %153 = vst.msk [vmem:[#allocation2 + $0x8] sm:$0xff] %vm49_vm0, %v150_v23 }
 0x11e   :  { %166 = dma.vmem_to_hbm [thread:$0]  %s159_s17, 256, %s161_s2, [#allocation3], %s260_s20, %s260_s20, %s261_s21  }
 0x11f   :  { %257 = dma.done.wait [#allocation3], 256  }
 0x120   :  { %258 = vsyncadd [#allocation3], 4294967040 }
 0x121   :  { %171 = vsyncpa [#allocation3], 1 }

</bundles_post_ra>
